<compile_context>
chip_gen: v6e
topology: v6e:2x2x1
jax: 0.10.0
libtpu: 0.0.40
codegen_flags: <defaults>
</compile_context>

<pallas_src>
import functools

import jax
import jax.numpy as jnp
from jax import lax
from jax.experimental import pallas as pl
from jax.experimental.pallas import tpu as pltpu

EPS = 1e-6
P_GEM = 3.0


def _round_up(a, b):
    return (a + b - 1) // b * b


def _vmem_capacity_bytes():
    # 128 MiB on v5e/v6e, 64 MiB per TensorCore on v7x; conservative fallback.
    try:
        return int(getattr(pltpu.get_tpu_info(), "vmem_capacity_bytes", 64 << 20))
    except Exception:
        return 64 << 20


# ----------------------------------------------------------------------------
# Pallas kernel: GeM pooling + classifier matmul (fused, HW-reduction grid axis)
# ----------------------------------------------------------------------------
def gem_classifier_kernel(x_ref, w_ref, feat_ref, logit_ref, acc_ref,
                          *, inv_hw, hw_rem):
    # x_ref:    (TN, THW, C)  feature-map tile (bf16/f32), C on the lane axis
    # w_ref:    (C, NC_PAD)   lane-padded classifier weight (bf16), resident
    # feat_ref: (TN, C)       GeM features (f32)
    # logit_ref:(TN, NC_PAD)  lane-dense logits (f32)
    # acc_ref:  (TN, C)       f32 running sum of clamp(x)^3 over HW
    # hw_rem:   static number of valid HW rows in the last (ragged) HW block,
    #           or 0 if THW divides HW exactly.
    k = pl.program_id(1)
    last_k = pl.num_programs(1) - 1

    @pl.when(k == 0)
    def _init():
        acc_ref[...] = jnp.zeros_like(acc_ref)

    # Clamp in the packed input dtype (bf16 VALU on v6e/v7x), then f32 cube+sum.
    x = jnp.maximum(x_ref[...], EPS).astype(jnp.float32)
    cube = x * x * x

    if hw_rem:
        is_tail = k == last_k

        @pl.when(jnp.logical_not(is_tail))
        def _full():
            acc_ref[...] += jnp.sum(cube, axis=1)

        @pl.when(is_tail)
        def _tail():
            # Static slice: only the hw_rem valid rows of the ragged tail block.
            acc_ref[...] += jnp.sum(cube[:, :hw_rem, :], axis=1)
    else:
        acc_ref[...] += jnp.sum(cube, axis=1)

    @pl.when(k == last_k)
    def _finalize():
        # pooled >= eps^3 for valid rows; the clamp also sanitizes garbage rows
        # of a ragged batch-tail block (their writes are dropped anyway).
        pooled = jnp.maximum(acc_ref[...] * inv_hw, EPS ** 3)
        feat = jnp.exp(jnp.log(pooled) * (1.0 / P_GEM))     # .pow(1/3)
        feat_ref[...] = feat
        logit_ref[...] = jnp.dot(feat.astype(w_ref.dtype), w_ref[...],
                                 preferred_element_type=jnp.float32)


def gem_classifier(fmap_nhwc, w_cls, *, input_vmem_budget=None):
    """fmap_nhwc: (N, H, W, C) backbone feature map (bf16 preferred).
    w_cls: (num_classes, C) torch nn.Linear weight layout.
    Returns (feat (N, C) f32, logits (N, num_classes) f32)."""
    N, H, W, C = fmap_nhwc.shape
    HW = H * W
    num_classes, c_in = w_cls.shape
    assert c_in == C, (w_cls.shape, C)
    NC_PAD = _round_up(max(num_classes, 1), 128)

    x = fmap_nhwc.reshape(N, HW, C)                 # free reshape in NHWC layout
    in_itemsize = jnp.dtype(x.dtype).itemsize
    hw_align = 8 * max(1, 4 // in_itemsize)         # 16 sublane rows for bf16, 8 for f32

    # Lane-padded resident classifier weight, bf16 (single MXU pass, half the VMEM).
    # TODO(synk): for reid-scale class counts (NC_PAD >~ 8192) add a third grid
    #             axis over NC instead of keeping the full weight resident.
    wt = jnp.transpose(w_cls).astype(jnp.bfloat16)  # (C, num_classes)
    if NC_PAD != num_classes:
        wt = jnp.pad(wt, ((0, 0), (0, NC_PAD - num_classes)))
    w_bytes_2buf = 2 * C * NC_PAD * 2               # double-buffered bf16 weight

    # --- per-generation VMEM budget for the streamed feature-map input ---------
    vmem_cap = _vmem_capacity_bytes()
    if input_vmem_budget is None:
        # ~48 MiB on 128-MiB chips (v5e/v6e), ~24 MiB on v7x's 64-MiB TC,
        # minus the resident weight and a small margin for outputs/scratch.
        input_vmem_budget = max(8 << 20, vmem_cap * 3 // 8 - w_bytes_2buf - (4 << 20))
    # Per (n, hw) row: 2 input buffers + f32 upcast/cube intermediate allowance.
    per_row = C * (2 * in_itemsize + 4)
    rows_max = max(hw_align, input_vmem_budget // per_row)

    # --- tile selection ---------------------------------------------------------
    if N * HW <= rows_max:                          # whole feature map in one block
        TN, THW = N, HW
    elif 8 * HW <= rows_max:                        # full HW per step, tile the batch
        TN = min(_round_up(N, 8), (rows_max // HW) // 8 * 8)
        THW = HW
    else:                                           # large maps: tile HW (reduction) too
        TN = N if N < 8 else 8
        THW = max(hw_align, (rows_max // TN) // hw_align * hw_align)
        if THW >= HW:
            THW = HW
    if TN >= N:
        TN = N
        if N >= 16:
            # v7x megacore: guarantee >= 2 steps on the "parallel" batch axis
            # while keeping TN a multiple of 8 for the output BlockSpecs.
            TN = _round_up(pl.cdiv(N, 2), 8)

    grid = (pl.cdiv(N, TN), pl.cdiv(HW, THW))
    hw_rem = HW % THW                               # valid rows of the ragged HW tail

    # --- explicit VMEM limit: actual tile footprint + headroom, per-gen cap -----
    needed = (2 * TN * THW * C * in_itemsize        # double-buffered input tiles
              + TN * THW * C * 4                    # f32 upcast/cube intermediate
              + w_bytes_2buf                        # resident bf16 weight
              + 2 * TN * C * 4 + 2 * TN * NC_PAD * 4  # output tiles
              + TN * C * 4)                         # f32 accumulator scratch
    vmem_limit = int(min(max(needed * 5 // 4 + (2 << 20), 32 << 20),
                         vmem_cap * 3 // 4))

    kernel = functools.partial(gem_classifier_kernel,
                               inv_hw=1.0 / float(HW), hw_rem=hw_rem)

    feat, logits_p = pl.pallas_call(
        kernel,
        out_shape=(jax.ShapeDtypeStruct((N, C), jnp.float32),
                   jax.ShapeDtypeStruct((N, NC_PAD), jnp.float32)),
        grid_spec=pltpu.PrefetchScalarGridSpec(
            num_scalar_prefetch=0,
            grid=grid,
            in_specs=[pl.BlockSpec((TN, THW, C), lambda i, k: (i, k, 0)),
                      pl.BlockSpec((C, NC_PAD), lambda i, k: (0, 0))],
            out_specs=(pl.BlockSpec((TN, C), lambda i, k: (i, 0)),
                       pl.BlockSpec((TN, NC_PAD), lambda i, k: (i, 0))),
            scratch_shapes=[pltpu.VMEM((TN, C), jnp.float32)]),
        compiler_params=pltpu.CompilerParams(
            dimension_semantics=("parallel", "arbitrary"),
            vmem_limit_bytes=vmem_limit),
    )(x, wt)

    return feat, logits_p[:, :num_classes]


def gem_classifier_ref(fmap_nhwc, w_cls):
    """Pure-JAX f32 reference of gem() + classifier on the same feature map."""
    clamp = float(jnp.bfloat16(EPS)) if fmap_nhwc.dtype == jnp.bfloat16 else EPS
    x = jnp.maximum(fmap_nhwc.astype(jnp.float32), jnp.float32(clamp))
    pooled = jnp.mean(x ** 3, axis=(1, 2))
    feat = pooled ** (1.0 / P_GEM)
    logits = feat @ w_cls.astype(jnp.float32).T
    return feat, logits


def _assert_close(got, want, tol):
    err = float(jnp.max(jnp.abs(got.astype(jnp.float32) - want.astype(jnp.float32))))
    scale = float(jnp.max(jnp.abs(want.astype(jnp.float32)))) + 1e-30
    assert err <= tol * scale, f"max|err|={err} vs tol*scale={tol * scale}"


# ----------------------------------------------------------------------------
# ResNet50 backbone in plain JAX, NHWC (native TPU conv layout), synthetic weights.
# TODO(synk): backbone convolutions stay in plain JAX/XLA, not hand-written
#             Pallas conv kernels; BatchNorm is folded to identity (eval mode,
#             default running stats, synthetic He weights — no pretrained load).
# TODO(synk): backbone_ibn_resnet50 is constructed in __init__ but never used
#             in forward(), so it is omitted here.
# ----------------------------------------------------------------------------
def conv2d(x, w, stride, pad):
    return lax.conv_general_dilated(
        x, w, window_strides=(stride, stride),
        padding=((pad, pad), (pad, pad)),
        dimension_numbers=('NHWC', 'HWIO', 'NHWC'))


def relu(x):
    return jnp.maximum(x, 0.0)


def maxpool_3x3_s2_p1(x):
    return lax.reduce_window(
        x, -jnp.inf, lax.max,
        window_dimensions=(1, 3, 3, 1),
        window_strides=(1, 2, 2, 1),
        padding=((0, 0), (1, 1), (1, 1), (0, 0)))


def he_conv(key, out_c, in_c, k):
    fan_in = in_c * k * k
    return (jax.random.normal(key, (k, k, in_c, out_c), jnp.float32)
            * jnp.sqrt(2.0 / fan_in))


def make_resnet50_params(key):
    keys = iter(jax.random.split(key, 256))
    params = {'stem': he_conv(next(keys), 64, 3, 7), 'layers': []}
    layers_cfg = [(64, 3, 1), (128, 4, 2), (256, 6, 2), (512, 3, 2)]
    inplanes = 64
    for planes, blocks, stride in layers_cfg:
        blk_list = []
        for b in range(blocks):
            s = stride if b == 0 else 1
            blk = {
                'conv1': he_conv(next(keys), planes, inplanes, 1),
                'conv2': he_conv(next(keys), planes, planes, 3),
                'conv3': he_conv(next(keys), planes * 4, planes, 1),
                'stride': s,
            }
            if b == 0:
                blk['down'] = he_conv(next(keys), planes * 4, inplanes, 1)
            blk_list.append(blk)
            inplanes = planes * 4
        params['layers'].append(blk_list)
    return params


def bottleneck(x, blk):
    s = blk['stride']
    identity = x
    out = relu(conv2d(x, blk['conv1'], 1, 0))
    out = relu(conv2d(out, blk['conv2'], s, 1))
    out = conv2d(out, blk['conv3'], 1, 0)
    if 'down' in blk:
        identity = conv2d(x, blk['down'], s, 0)
    return relu(out + identity)


def resnet50_forward(params, x_nchw):
    x = jnp.transpose(x_nchw, (0, 2, 3, 1))     # NCHW image -> NHWC (tiny, 3 channels)
    x = relu(conv2d(x, params['stem'], 2, 3))   # 7x7 s2 p3
    x = maxpool_3x3_s2_p1(x)
    for layer in params['layers']:
        for blk in layer:
            x = bottleneck(x, blk)
    # Feed the fused GeM+classifier kernel in bf16: the elementwise convert fuses
    # into the last bottleneck's add+ReLU fusion (bf16 written directly to HBM),
    # halving the kernel's dominant HBM read.
    return x.astype(jnp.bfloat16)               # (N, H/32, W/32, 2048) NHWC


# ----------------------------------------------------------------------------
# CrossModality_Student.forward
# ----------------------------------------------------------------------------
def cross_modality_student_forward(backbone_params, w_cls, x):
    fmap = resnet50_forward(backbone_params, x)        # (N, h, w, 2048) NHWC bf16
    feat, logits = gem_classifier(fmap, w_cls)         # (N, 2048), (N, num_classes)
    return feat, logits


if __name__ == "__main__":
    key = jax.random.PRNGKey(0)
    k_img, k_net, k_cls = jax.random.split(key, 3)

    num_classes = 8
    x = jax.random.normal(k_img, (2, 3, 64, 64), jnp.float32)       # NCHW image
    backbone_params = make_resnet50_params(k_net)
    # nn.Linear(2048, num_classes, bias=False) weight: (num_classes, 2048)
    w_cls = jax.random.normal(k_cls, (num_classes, 2048), jnp.float32) / jnp.sqrt(2048.0)

    feat, logits = cross_modality_student_forward(backbone_params, w_cls, x)
    jax.block_until_ready((feat, logits))

    assert feat.shape == (2, 2048), feat.shape
    assert logits.shape == (2, num_classes), logits.shape
    assert bool(jnp.all(jnp.isfinite(feat))) and bool(jnp.all(jnp.isfinite(logits)))

    # Correctness vs a pure-JAX f32 GeM+classifier reference on the same bf16 fmap.
    fmap = resnet50_forward(backbone_params, x)
    ref_feat, ref_logits = gem_classifier_ref(fmap, w_cls)
    _assert_close(feat, ref_feat, 1e-3)
    _assert_close(logits, ref_logits, 2e-2)        # bf16 MXU matmul tolerance

    # Exercise the tiled path (batch tiling + ragged-HW reduction tail) by forcing
    # a tiny input budget; compare against the same pure-JAX reference.
    kf, kw = jax.random.split(jax.random.PRNGKey(1))
    fmap_t = jax.random.normal(kf, (10, 5, 5, 256), jnp.float32).astype(jnp.bfloat16)
    w_t = jax.random.normal(kw, (8, 256), jnp.float32) / 16.0
    feat_t, logits_t = gem_classifier(fmap_t, w_t, input_vmem_budget=128 * 1024)
    jax.block_until_ready((feat_t, logits_t))
    ref_ft, ref_lt = gem_classifier_ref(fmap_t, w_t)
    _assert_close(feat_t, ref_ft, 1e-3)
    _assert_close(logits_t, ref_lt, 2e-2)

    print("KERNEL_OK")
</pallas_src>

<mosaic_0001>
module attributes {stable_mosaic.version = 11 : i64} {
  func.func @gem_classifier_kernel(%arg0: i32, %arg1: i32, %arg2: memref<2x4x2048xbf16, #tpu.memory_space<vmem>>, %arg3: memref<2048x128xbf16, #tpu.memory_space<vmem>>, %arg4: memref<2x2048xf32, #tpu.memory_space<vmem>>, %arg5: memref<2x128xf32, #tpu.memory_space<vmem>>, %arg6: memref<2x2048xf32, #tpu.memory_space<vmem>>) attributes {dimension_semantics = [#tpu.dimension_semantics<parallel>, #tpu.dimension_semantics<arbitrary>], iteration_bounds = array<i64: 1, 1>, scalar_prefetch = 0 : i64, scratch_operands = 1 : i64, tpu.core_type = #tpu.core_type<tc>, window_params = [{transform_indices = @transform_0, window_bounds = array<i64: 2, 4, 2048>}, {pipeline_mode = #tpu.pipeline_mode<synchronous>, transform_indices = @transform_1, window_bounds = array<i64: 2048, 128>}, {transform_indices = @transform_2, window_bounds = array<i64: 2, 2048>}, {transform_indices = @transform_3, window_bounds = array<i64: 2, 128>}]} {
    %c0_i32 = arith.constant 0 : i32
    %0 = arith.cmpi eq, %arg1, %c0_i32 : i32
    %1 = arith.extui %0 : i1 to i32
    %c0_i32_0 = arith.constant 0 : i32
    %2 = arith.cmpi ne, %1, %c0_i32_0 : i32
    scf.if %2 {
      %cst_10 = arith.constant 0.000000e+00 : f32
      %16 = vector.broadcast %cst_10 : f32 to vector<2x2048xf32>
      %c0_11 = arith.constant 0 : index
      %c0_12 = arith.constant 0 : index
      %17 = vector.load %arg6[%c0_11, %c0_12] : memref<2x2048xf32, #tpu.memory_space<vmem>>, vector<2x2048xf32>
      tpu.vector_store %arg6[%c0_11, %c0_12], %16 {strides = array<i32>} : memref<2x2048xf32, #tpu.memory_space<vmem>>, vector<2x2048xf32>,
    } else {
    }
    %c0 = arith.constant 0 : index
    %c0_1 = arith.constant 0 : index
    %c0_2 = arith.constant 0 : index
    %3 = vector.load %arg2[%c0, %c0_1, %c0_2] : memref<2x4x2048xbf16, #tpu.memory_space<vmem>>, vector<2x4x2048xbf16>
    %cst = arith.constant 9.983770e-07 : bf16
    %4 = vector.broadcast %cst : bf16 to vector<2x4x2048xbf16>
    %5 = arith.maximumf %3, %4 : vector<2x4x2048xbf16>
    %6 = arith.extf %5 : vector<2x4x2048xbf16> to vector<2x4x2048xf32>
    %7 = arith.mulf %6, %6 : vector<2x4x2048xf32>
    %8 = arith.mulf %7, %6 : vector<2x4x2048xf32>
    %c0_3 = arith.constant 0 : index
    %c0_4 = arith.constant 0 : index
    %9 = vector.load %arg6[%c0_3, %c0_4] : memref<2x2048xf32, #tpu.memory_space<vmem>>, vector<2x2048xf32>
    %cst_5 = arith.constant dense<0.000000e+00> : vector<2x2048xf32>
    %10 = vector.multi_reduction <add>, %8, %cst_5 [1] : vector<2x4x2048xf32> to vector<2x2048xf32>
    %11 = arith.addf %9, %10 : vector<2x2048xf32>
    %c0_6 = arith.constant 0 : index
    %c0_7 = arith.constant 0 : index
    %12 = vector.load %arg6[%c0_6, %c0_7] : memref<2x2048xf32, #tpu.memory_space<vmem>>, vector<2x2048xf32>
    tpu.vector_store %arg6[%c0_6, %c0_7], %11 {strides = array<i32>} : memref<2x2048xf32, #tpu.memory_space<vmem>>, vector<2x2048xf32>,
    %c0_i32_8 = arith.constant 0 : i32
    %13 = arith.cmpi eq, %arg1, %c0_i32_8 : i32
    %14 = arith.extui %13 : i1 to i32
    %c0_i32_9 = arith.constant 0 : i32
    %15 = arith.cmpi ne, %14, %c0_i32_9 : i32
    scf.if %15 {
      %c0_10 = arith.constant 0 : index
      %c0_11 = arith.constant 0 : index
      %16 = vector.load %arg6[%c0_10, %c0_11] : memref<2x2048xf32, #tpu.memory_space<vmem>>, vector<2x2048xf32>
      %cst_12 = arith.constant 2.500000e-01 : f32
      %17 = vector.broadcast %cst_12 : f32 to vector<2x2048xf32>
      %18 = arith.mulf %16, %17 : vector<2x2048xf32>
      %cst_13 = arith.constant 1.000000e-18 : f32
      %19 = vector.broadcast %cst_13 : f32 to vector<2x2048xf32>
      %20 = arith.maximumf %18, %19 : vector<2x2048xf32>
      %21 = math.log %20 : vector<2x2048xf32>
      %cst_14 = arith.constant 0.333333343 : f32
      %22 = vector.broadcast %cst_14 : f32 to vector<2x2048xf32>
      %23 = arith.mulf %21, %22 : vector<2x2048xf32>
      %24 = math.exp %23 : vector<2x2048xf32>
      %c0_15 = arith.constant 0 : index
      %c0_16 = arith.constant 0 : index
      %25 = vector.load %arg4[%c0_15, %c0_16] : memref<2x2048xf32, #tpu.memory_space<vmem>>, vector<2x2048xf32>
      tpu.vector_store %arg4[%c0_15, %c0_16], %24 {strides = array<i32>} : memref<2x2048xf32, #tpu.memory_space<vmem>>, vector<2x2048xf32>,
      %26 = arith.truncf %24 : vector<2x2048xf32> to vector<2x2048xbf16>
      %c0_17 = arith.constant 0 : index
      %c0_18 = arith.constant 0 : index
      %27 = vector.load %arg3[%c0_17, %c0_18] : memref<2048x128xbf16, #tpu.memory_space<vmem>>, vector<2048x128xbf16>
      %cst_19 = arith.constant dense<0.000000e+00> : vector<2x128xf32>
      %28 = tpu.matmul %26, %27, %cst_19 {dimension_numbers = #tpu.dot_dimension_numbers<[1], [0], [0], [1], [0, 0, 1, 1], [], []>} : vector<2x2048xbf16>, vector<2048x128xbf16>, vector<2x128xf32> -> vector<2x128xf32>
      %c0_20 = arith.constant 0 : index
      %c0_21 = arith.constant 0 : index
      %29 = vector.load %arg5[%c0_20, %c0_21] : memref<2x128xf32, #tpu.memory_space<vmem>>, vector<2x128xf32>
      tpu.vector_store %arg5[%c0_20, %c0_21], %28 {strides = array<i32>} : memref<2x128xf32, #tpu.memory_space<vmem>>, vector<2x128xf32>,
    } else {
    }
    return
  }
  func.func @transform_0(%arg0: i32, %arg1: i32) -> (i32, i32, i32) {
    %c0_i32 = arith.constant 0 : i32
    %c0_i32_0 = arith.constant 0 : i32
    return %arg0, %arg1, %c0_i32 : i32, i32, i32
  }
  func.func @transform_1(%arg0: i32, %arg1: i32) -> (i32, i32) {
    %c0_i32 = arith.constant 0 : i32
    %c0_i32_0 = arith.constant 0 : i32
    %c0_i32_1 = arith.constant 0 : i32
    return %c0_i32, %c0_i32_0 : i32, i32
  }
  func.func @transform_2(%arg0: i32, %arg1: i32) -> (i32, i32) {
    %c0_i32 = arith.constant 0 : i32
    %c0_i32_0 = arith.constant 0 : i32
    return %arg0, %c0_i32 : i32, i32
  }
  func.func @transform_3(%arg0: i32, %arg1: i32) -> (i32, i32) {
    %c0_i32 = arith.constant 0 : i32
    %c0_i32_0 = arith.constant 0 : i32
    return %arg0, %c0_i32 : i32, i32
  }
}

</mosaic_0001>

<bundles_post_ra>
// kernel: tpu_custom_call.1
= control target key start
LH: loop header
LB: loop body
LE: loop exit
PB: predicated region body
PF: predicated region fallthrough
CT: control target
= control target key end

     0   :  { %9 = vsyncpa [#allocation4], 0  ;;  %s2799_s0 = inlined_call_operand.hbm [shape: bf16[2,4,2048], index: 0, kind: input, shape index: {}]   ;;  %s2800_s1 = inlined_call_operand.hbm [shape: bf16[2048,128], index: 1, kind: input, shape index: {}]   ;;  %s2801_s2 = inlined_call_operand.hbm [shape: f32[2,2048], index: 2, kind: output, shape index: {0}]   ;;  %s2802_s3 = inlined_call_operand.hbm [shape: f32[2,128], index: 3, kind: output, shape index: {1}]  }
   0x1   :  { %10 = vsyncpa [#allocation7], 0 }
   0x2   :  { %11 = vsyncpa [#allocation5], 0 }
   0x3   :  { %12 = vsyncpa [#allocation10], 0  ;;  %s2672_s12 = smov [#allocation3]  }
   0x4   :  { %s18_s13 = sshll.u32 %s2672_s12, 4  ;;  %s19_s13 = int_to_ptr.vmem [resolvable:$true] %s18_s13 }
   0x5   :  { %s2592_s14 = scalar_lea.vmem %s19_s13, 1024  ;;  %p2597_p1 = scmp.lt.s32.totalorder %s19_s13, %s19_s13 }
   0x6   :  { %p2593_p0 = scmp.ne.s32.totalorder %s19_s13, %s2592_s14  ;;  %p2598_p2 = scmp.lt.s32.totalorder %s2592_s14, %s2592_s14 }
   0x8   :  { %p2599_p3 = por %p2598_p2, %p2597_p1 }
   0xa   :  { %p2600_p4 = pnand %p2599_p3, %p2593_p0 }
   0xc   :  { %2603 = shalt.err (!%p2600_p4)
}
   0xd   :  { %s2673_s15 = smov 512   ;;  %s2674_s16 = smov 32  }
   0xe   :  { %24 = dma.hbm_to_vmem [thread:$0]  %s2799_s0, 1024, %s19_s13, [#allocation4], %s2673_s15, %s2673_s15, %s2674_s16  }
   0xf   :  { %s2675_s19 = smov [#allocation6]  }
  0x10   :  { %s30_s20 = sshll.u32 %s2675_s19, 4  ;;  %s31_s20 = int_to_ptr.vmem [resolvable:$true] %s30_s20 }
  0x11   :  { %s2612_s21 = scalar_lea.vmem %s31_s20, 16384  ;;  %p2617_p6 = scmp.lt.s32.totalorder %s31_s20, %s31_s20 }
  0x12   :  { %p2613_p5 = scmp.ne.s32.totalorder %s31_s20, %s2612_s21  ;;  %p2618_p7 = scmp.lt.s32.totalorder %s2612_s21, %s2612_s21 }
  0x14   :  { %p2619_p8 = por %p2618_p7, %p2617_p6 }
  0x16   :  { %p2620_p9 = pnand %p2619_p8, %p2613_p5 }
  0x18   :  { %2623 = shalt.err (!%p2620_p9)
}
  0x19   :  { %s2676_s22 = smov 64   ;;  %s2677_s23 = smov 4  }
  0x1a   :  { %36 = dma.hbm_to_vmem [thread:$0]  %s2800_s1, 16384, %s31_s20, [#allocation7], %s2676_s22, %s2676_s22, %s2677_s23  }
  0x1b   :  { %2664 = dma.done.wait [#allocation4], 1024  }
  0x1c   :  { %2665 = vsyncadd [#allocation4], 4294966272 }
  0x1d   :  { %2666 = dma.done.wait [#allocation7], 16384  }
  0x1e   :  { %2667 = vsyncadd [#allocation7], 4294950912  ;;  %v2440_v0 = vld [vmem:[#allocation6 + $0x78] sm:$0xff]   ;;  %v2444_v4 = vld [vmem:[#allocation6 + $0x70] sm:$0xff]   ;;  %v2678_v34 = vmov 897987974   ;;  %v431_v45 = vlaneseq }
  0x1f   :  { %v2441_v1 = vld [vmem:[#allocation6 + $0x38] sm:$0xff]   ;;  %2254 = vmatprep.subr.bf16.mxu0 %v2440_v0  ;;  %v2445_v5 = vld [vmem:[#allocation6 + $0x30] sm:$0xff]   ;;  %v2448_v8 = vld [vmem:[#allocation6 + $0x68] sm:$0xff]   ;;  %v2679_v43 = vmov 1983009808   ;;  %vm169_vm0 = vcmask 1043456  }
  0x20   :  { %v2442_v2 = vld [vmem:[#allocation6 + $0xf8] sm:$0xff]   ;;  %2255 = vmatpush3.bf16.msra.mxu0 %v2441_v1  ;;  %v2446_v6 = vld [vmem:[#allocation6 + $0xf0] sm:$0xff]   ;;  %v2449_v9 = vld [vmem:[#allocation6 + $0x28] sm:$0xff]   ;;  %v2710_v44 = vunpack.c.l.s4 %v2679_v43  ;;  %v432_v55 = vshrl.u32 %v431_v45, 7  ;;  %vm567_vm1 = vcmask 1041409   ;;  %vm569_vm2 = vcmask 1043459  }
  0x21   :  { %v2443_v3 = vld [vmem:[#allocation6 + $0xb8] sm:$0xff]   ;;  %2276 = vmatprep.subr.bf16.mxu1 %v2442_v2  ;;  %2256 = vmatprep.subr.bf16.mxu0 %v2444_v4  ;;  %v2447_v7 = vld [vmem:[#allocation6 + $0xb0] sm:$0xff]   ;;  %v2450_v10 = vld [vmem:[#allocation6 + $0xe8] sm:$0xff]   ;;  %vm571_vm3 = vcmask 1045509   ;;  %vm573_vm4 = vcmask 1047559   ;;  %s2680_s0 = smov [#allocation8]  }
  0x22   :  { %2277 = vmatpush3.bf16.msra.mxu1 %v2443_v3  ;;  %v2451_v11 = vld [vmem:[#allocation6 + $0xa8] sm:$0xff]   ;;  %v2452_v12 = vld [vmem:[#allocation6 + $0x60] sm:$0xff]   ;;  %v2456_v16 = vld [vmem:[#allocation6 + $0x58] sm:$0xff]   ;;  %v430_v54 = vunpack.c.0.s8 %v2710_v44  ;;  %s2102_s1 = sshll.u32 %s2680_s0, 4  ;;  %s2103_s1 = int_to_ptr.vmem [resolvable:$true] %s2102_s1 }
  0x23   :  { %2278 = vmatprep.subr.bf16.mxu1 %v2446_v6  ;;  %v2453_v13 = vld [vmem:[#allocation6 + $0x20] sm:$0xff]   ;;  %v2457_v17 = vld [vmem:[#allocation6 + $0x18] sm:$0xff]   ;;  %v2460_v20 = vld [vmem:[#allocation6 + $0x50] sm:$0xff]   ;;  %s2624_s26 = scalar_lea.vmem %s2103_s1, 512  ;;  %p2629_p11 = scmp.lt.s32.totalorder %s2103_s1, %s2103_s1 }
  0x24   :  { %2257 = vmatpush3.bf16.msra.mxu0 %v2445_v5  ;;  %v2454_v14 = vld [vmem:[#allocation6 + $0xe0] sm:$0xff]   ;;  %v2458_v18 = vld [vmem:[#allocation6 + $0xd8] sm:$0xff]   ;;  %v2461_v21 = vld [vmem:[#allocation6 + $0x10] sm:$0xff]   ;;  %p2625_p10 = scmp.ne.s32.totalorder %s2103_s1, %s2624_s26  ;;  %p2630_p12 = scmp.lt.s32.totalorder %s2624_s26, %s2624_s26 }
  0x25   :  { %2258 = vmatprep.subr.bf16.mxu0 %v2448_v8  ;;  %v2455_v15 = vld [vmem:[#allocation6 + $0xa0] sm:$0xff]   ;;  %v2459_v19 = vld [vmem:[#allocation6 + $0x98] sm:$0xff]   ;;  %v2462_v22 = vld [vmem:[#allocation6 + $0xd0] sm:$0xff]  }
  0x26   :  { %2279 = vmatpush3.bf16.msra.mxu1 %v2447_v7  ;;  %v2463_v23 = vld [vmem:[#allocation6 + $0x90] sm:$0xff]   ;;  %v2464_v24 = vld [vmem:[#allocation6 + $0x48] sm:$0xff]   ;;  %v2468_v28 = vld [vmem:[#allocation6 + $0x40] sm:$0xff]   ;;  %p2631_p13 = por %p2630_p12, %p2629_p11 }
  0x27   :  { %2280 = vmatprep.subr.bf16.mxu1 %v2450_v10  ;;  %v2465_v25 = vld [vmem:[#allocation6 + $0x8] sm:$0xff]   ;;  %v2469_v29 = vld [vmem:[#allocation6] sm:$0xff]   ;;  %v2472_v37 = vld [vmem:[#allocation6 + $0x178] sm:$0xff]  }
  0x28   :  { %2259 = vmatpush3.bf16.msra.mxu0 %v2449_v9  ;;  %v2466_v26 = vld [vmem:[#allocation6 + $0xc8] sm:$0xff]   ;;  %v2470_v30 = vld [vmem:[#allocation6 + $0xc0] sm:$0xff]   ;;  %v2474_v42 = vld [vmem:[#allocation6 + $0x1f8] sm:$0xff]   ;;  %p2632_p0 = pnand %p2631_p13, %p2625_p10 }
  0x29   :  { %2260 = vmatprep.subr.bf16.mxu0 %v2452_v12  ;;  %v2467_v27 = vld [vmem:[#allocation6 + $0x88] sm:$0xff]   ;;  %v2471_v31 = vld [vmem:[#allocation6 + $0x80] sm:$0xff]  }
  0x2a   :  { %2281 = vmatpush3.bf16.msra.mxu1 %v2451_v11  ;;  %v53_v32 = vld [vmem:[#allocation3] sm:$0xff] }
  0x2b   :  { %2282 = vmatprep.subr.bf16.mxu1 %v2454_v14  ;;  %v57_v33 = vld [vmem:[#allocation3 + $0x20] sm:$0xff]  ;;  %v61_v35 = vmax.bf16 %v2678_v34, %v53_v32 }
  0x2c   :  { %2261 = vmatpush3.bf16.msra.mxu0 %v2453_v13  ;;  %v65_v36 = vmax.bf16 %v2678_v34, %v57_v33 }
  0x2d   :  { %2262 = vmatprep.subr.bf16.mxu0 %v2456_v16  ;;  %v69_v38 = vunpack.c.l.bf16 %v61_v35  ;;  %v70_v39 = vunpack.c.h.bf16 %v61_v35 }
  0x2e   :  { %2283 = vmatpush3.bf16.msra.mxu1 %v2455_v15  ;;  %v77_v40 = vunpack.c.l.bf16 %v65_v36  ;;  %v78_v41 = vunpack.c.h.bf16 %v65_v36 }
  0x2f   :  { %2284 = vmatprep.subr.bf16.mxu1 %v2458_v18  ;;  %v85_v46 = vmul.f32 %v69_v38, %v69_v38  ;;  %v86_v47 = vmul.f32 %v70_v39, %v70_v39 }
  0x30   :  { %2263 = vmatpush3.bf16.msra.mxu0 %v2457_v17  ;;  %v93_v48 = vmul.f32 %v77_v40, %v77_v40  ;;  %v94_v49 = vmul.f32 %v78_v41, %v78_v41 }
  0x31   :  { %2264 = vmatprep.subr.bf16.mxu0 %v2460_v20  ;;  %v101_v50 = vmul.f32 %v85_v46, %v69_v38  ;;  %v102_v51 = vmul.f32 %v86_v47, %v70_v39 }
  0x32   :  { %2285 = vmatpush3.bf16.msra.mxu1 %v2459_v19  ;;  %v109_v52 = vmul.f32 %v93_v48, %v77_v40  ;;  %v110_v53 = vmul.f32 %v94_v49, %v78_v41 }
  0x33   :  { %2286 = vmatprep.subr.bf16.mxu1 %v2462_v22  ;;  %v137_v56 = vcombine.high %v101_v50, %v101_v50  ;;  %v138_v57 = vcombine.high %v102_v51, %v102_v51  ;;  %v170_v60 = vsel %vm169_vm0, %v101_v50, 0.0  ;;  %v184_v61 = vsel %vm169_vm0, %v102_v51, 0.0 }
  0x34   :  { %2265 = vmatpush3.bf16.msra.mxu0 %v2461_v21  ;;  %v145_v58 = vcombine.high %v109_v52, %v109_v52  ;;  %v146_v59 = vcombine.high %v110_v53, %v110_v53  ;;  %v282_v62 = vsel %vm169_vm0, %v109_v52, 0.0  ;;  %v296_v63 = vsel %vm169_vm0, %v110_v53, 0.0 }
  0x35   :  { %2266 = vmatprep.subr.bf16.mxu0 %v2464_v24  ;;  %v171_v0 = vrot.slane %v170_v60, 4  ;;  %v177_v1 = vsel %vm169_vm0, %v137_v56, 0.0  ;;  %v185_v2 = vrot.slane %v184_v61, 4  ;;  %v191_v3 = vsel %vm169_vm0, %v138_v57, 0.0 }
  0x36   :  { %2287 = vmatpush3.bf16.msra.mxu1 %v2463_v23  ;;  %v178_v4 = vrot.slane %v177_v1, 4  ;;  %v192_v5 = vrot.slane %v191_v3, 4  ;;  %v283_v6 = vrot.slane %v282_v62, 4  ;;  %v289_v7 = vsel %vm169_vm0, %v145_v58, 0.0 }
  0x37   :  { %2288 = vmatprep.subr.bf16.mxu1 %v2466_v26  ;;  %v172_v8 = vadd.f32 %v171_v0, %v170_v60  ;;  %v186_v9 = vadd.f32 %v185_v2, %v184_v61  ;;  %v290_v10 = vrot.slane %v289_v7, 4  ;;  %v297_v11 = vrot.slane %v296_v63, 4 }
  0x38   :  { %2267 = vmatpush3.bf16.msra.mxu0 %v2465_v25  ;;  %v179_v12 = vadd.f32 %v178_v4, %v177_v1  ;;  %v193_v13 = vadd.f32 %v192_v5, %v191_v3  ;;  %v284_v14 = vadd.f32 %v283_v6, %v282_v62  ;;  %v303_v15 = vsel %vm169_vm0, %v146_v59, 0.0  ;;  %v58_v3 = vld [vmem:[#allocation3 + $0x28] sm:$0xff] }
  0x39   :  { %2268 = vmatprep.subr.bf16.mxu0 %v2468_v28  ;;  %v173_v16 = vrot.slane %v172_v8, 2  ;;  %v187_v17 = vrot.slane %v186_v9, 2  ;;  %v291_v18 = vadd.f32 %v290_v10, %v289_v7  ;;  %v298_v19 = vadd.f32 %v297_v11, %v296_v63 }
  0x3a   :  { %2289 = vmatpush3.bf16.msra.mxu1 %v2467_v27  ;;  %v180_v20 = vrot.slane %v179_v12, 2  ;;  %v194_v21 = vrot.slane %v193_v13, 2  ;;  %v285_v22 = vrot.slane %v284_v14, 2  ;;  %v304_v23 = vrot.slane %v303_v15, 4 }
  0x3b   :  { %2290 = vmatprep.subr.bf16.mxu1 %v2470_v30  ;;  %v174_v24 = vadd.f32 %v173_v16, %v172_v8  ;;  %v188_v25 = vadd.f32 %v187_v17, %v186_v9  ;;  %v292_v26 = vrot.slane %v291_v18, 2  ;;  %v299_v27 = vrot.slane %v298_v19, 2 }
  0x3c   :  { %2269 = vmatpush3.bf16.msra.mxu0 %v2469_v29  ;;  %v181_v28 = vadd.f32 %v180_v20, %v179_v12  ;;  %v195_v29 = vadd.f32 %v194_v21, %v193_v13  ;;  %v286_v30 = vadd.f32 %v285_v22, %v284_v14  ;;  %v2721_v50 = vsub.s32 %v430_v54, %v432_v55  ;;  %v54_v55 = vld [vmem:[#allocation3 + $0x8] sm:$0xff] }
  0x3d   :  { %2298 = vmatprep.subr.bf16.mxu0 %v2472_v37  ;;  %v175_v32 = vrot.slane %v174_v24, 1  ;;  %v189_v33 = vrot.slane %v188_v25, 1  ;;  %v293_v35 = vadd.f32 %v292_v26, %v291_v18  ;;  %v300_v36 = vadd.f32 %v299_v27, %v298_v19 }
  0x3e   :  { %2291 = vmatpush3.bf16.msra.mxu1 %v2471_v31  ;;  %v305_v31 = vadd.f32 %v304_v23, %v303_v15  ;;  %v182_v37 = vrot.slane %v181_v28, 1  ;;  %v196_v38 = vrot.slane %v195_v29, 1  ;;  %v287_v39 = vrot.slane %v286_v30, 1 }
  0x3f   :  { %2320 = vmatprep.subr.bf16.mxu1 %v2474_v42  ;;  %v176_v41 = vadd.f32 %v175_v32, %v174_v24  ;;  %v190_v42 = vadd.f32 %v189_v33, %v188_v25  ;;  %v294_v43 = vrot.slane %v293_v35, 1  ;;  %v301_v44 = vrot.slane %v300_v36, 1 }
  0x40   :  { %v306_v40 = vrot.slane %v305_v31, 2  ;;  %v183_v45 = vadd.f32 %v182_v37, %v181_v28  ;;  %v197_v46 = vadd.f32 %v196_v38, %v195_v29  ;;  %v288_v47 = vadd.f32 %v287_v39, %v286_v30 }
  0x41   :  { %v295_v49 = vadd.f32 %v294_v43, %v293_v35  ;;  %v302_v51 = vadd.f32 %v301_v44, %v300_v36  ;;  %v62_v4 = vmax.bf16 %v2678_v34, %v54_v55  ;;  %v66_v6 = vmax.bf16 %v2678_v34, %v58_v3 }
  0x42   :  { %v307_v48 = vadd.f32 %v306_v40, %v305_v31  ;;  %v426_v53 = vcombine.low %v176_v41, %v183_v45  ;;  %v427_v56 = vcombine.low %v190_v42, %v197_v46 }
  0x43   :  { %v494_v57 = vcombine.low %v288_v47, %v295_v49  ;;  %v71_v8 = vunpack.c.l.bf16 %v62_v4  ;;  %v72_v9 = vunpack.c.h.bf16 %v62_v4  ;;  %v79_v11 = vunpack.c.l.bf16 %v66_v6 }
  0x44   :  { %v308_v52 = vrot.slane %v307_v48, 1  ;;  %v434_v59 = vrot.slane %v426_v53, %v2721_v50  ;;  %v441_v60 = vrot.slane %v427_v56, %v2721_v50  ;;  %v80_v12 = vunpack.c.h.bf16 %v66_v6 }
  0x45   :  { %v502_v62 = vrot.slane %v494_v57, %v2721_v50  ;;  %v87_v14 = vmul.f32 %v71_v8, %v71_v8  ;;  %v88_v15 = vmul.f32 %v72_v9, %v72_v9  ;;  %v95_v16 = vmul.f32 %v79_v11, %v79_v11 }
  0x46   :  { %v309_v58 = vadd.f32 %v308_v52, %v307_v48  ;;  %v442_v0 = vcombine.low %v434_v59, %v441_v60  ;;  %v96_v17 = vmul.f32 %v80_v12, %v80_v12 }
  0x47   :  { %v103_v19 = vmul.f32 %v87_v14, %v71_v8  ;;  %v104_v20 = vmul.f32 %v88_v15, %v72_v9  ;;  %v111_v21 = vmul.f32 %v95_v16, %v79_v11 }
  0x48   :  { %v495_v61 = vcombine.low %v302_v51, %v309_v58  ;;  %v112_v22 = vmul.f32 %v96_v17, %v80_v12 }
  0x49   :  { %v139_v23 = vcombine.high %v103_v19, %v103_v19  ;;  %v140_v24 = vcombine.high %v104_v20, %v104_v20  ;;  %v198_v25 = vsel %vm169_vm0, %v103_v19, 0.0  ;;  %v147_v26 = vcombine.high %v111_v21, %v111_v21 }
  0x4a   :  { %v509_v63 = vrot.slane %v495_v61, %v2721_v50  ;;  %v148_v27 = vcombine.high %v112_v22, %v112_v22  ;;  %v199_v28 = vrot.slane %v198_v25, 4  ;;  %v212_v29 = vsel %vm169_vm0, %v104_v20, 0.0 }
  0x4b   :  { %v205_v30 = vsel %vm169_vm0, %v139_v23, 0.0  ;;  %v213_v31 = vrot.slane %v212_v29, 4  ;;  %v219_v32 = vsel %vm169_vm0, %v140_v24, 0.0  ;;  %v310_v33 = vsel %vm169_vm0, %v111_v21, 0.0 }
  0x4c   :  { %v510_v1 = vcombine.low %v502_v62, %v509_v63  ;;  %v200_v35 = vadd.f32 %v199_v28, %v198_v25  ;;  %v206_v36 = vrot.slane %v205_v30, 4  ;;  %v220_v37 = vrot.slane %v219_v32, 4 }
  0x4d   :  { %v311_v38 = vrot.slane %v310_v33, 4  ;;  %v214_v39 = vadd.f32 %v213_v31, %v212_v29  ;;  %v317_v40 = vsel %vm169_vm0, %v147_v26, 0.0  ;;  %v324_v41 = vsel %vm169_vm0, %v112_v22, 0.0 }
  0x4e   :  { %v566_v54 = vrot.slane %v510_v1, 7  ;;  %v331_v42 = vsel %vm169_vm0, %v148_v27, 0.0  ;;  %v201_v43 = vrot.slane %v200_v35, 2  ;;  %v207_v44 = vadd.f32 %v206_v36, %v205_v30 }
  0x4f   :  { %v221_v45 = vadd.f32 %v220_v37, %v219_v32  ;;  %v312_v46 = vadd.f32 %v311_v38, %v310_v33  ;;  %v215_v47 = vrot.slane %v214_v39, 2  ;;  %v318_v48 = vrot.slane %v317_v40, 4 }
  0x50   :  { %v568_v2 = vsel %vm567_vm1, %v566_v54, %v442_v0  ;;  %v325_v49 = vrot.slane %v324_v41, 4  ;;  %v332_v51 = vrot.slane %v331_v42, 4  ;;  %v202_v52 = vadd.f32 %v201_v43, %v200_v35 }
  0x51   :  { %v570_v5 = vsel %vm569_vm2, %v566_v54, %v568_v2  ;;  %v208_v53 = vrot.slane %v207_v44, 2  ;;  %v222_v56 = vrot.slane %v221_v45, 2  ;;  %v313_v57 = vrot.slane %v312_v46, 2 }
  0x52   :  { %v572_v7 = vsel %vm571_vm3, %v566_v54, %v570_v5  ;;  %v216_v58 = vadd.f32 %v215_v47, %v214_v39  ;;  %v319_v59 = vadd.f32 %v318_v48, %v317_v40  ;;  %v326_v60 = vadd.f32 %v325_v49, %v324_v41  ;;  %v55_v40 = vld [vmem:[#allocation3 + $0x10] sm:$0xff] }
  0x53   :  { %v574_v10 = vsel %vm573_vm4, %v566_v54, %v572_v7  ;;  %v333_v61 = vadd.f32 %v332_v51, %v331_v42  ;;  %v203_v62 = vrot.slane %v202_v52, 1  ;;  %v209_v63 = vadd.f32 %v208_v53, %v207_v44  ;;  %v59_v41 = vld [vmem:[#allocation3 + $0x30] sm:$0xff] }
  0x54   :  { %v615_v13 = vmul.f32 0.25, %v574_v10  ;;  %v223_v0 = vadd.f32 %v222_v56, %v221_v45  ;;  %v314_v1 = vadd.f32 %v313_v57, %v312_v46  ;;  %v217_v54 = vrot.slane %v216_v58, 1 }
  0x55   :  { %v320_v55 = vrot.slane %v319_v59, 2  ;;  %v327_v2 = vrot.slane %v326_v60, 2  ;;  %v334_v3 = vrot.slane %v333_v61, 2  ;;  %v204_v4 = vadd.f32 %v203_v62, %v202_v52 }
  0x56   :  { %v619_v18 = vmax.f32 %v615_v13, 1e-18  ;;  %v210_v5 = vrot.slane %v209_v63, 1  ;;  %v224_v6 = vrot.slane %v223_v0, 1  ;;  %v315_v7 = vrot.slane %v314_v1, 1 }
  0x57   :  { %v218_v8 = vadd.f32 %v217_v54, %v216_v58  ;;  %v321_v9 = vadd.f32 %v320_v55, %v319_v59  ;;  %v328_v10 = vadd.f32 %v327_v2, %v326_v60  ;;  %v335_v11 = vadd.f32 %v334_v3, %v333_v61 }
  0x58   :  { %2568 = vlog2.f32 %v619_v18  ;;  %v211_v13 = vadd.f32 %v210_v5, %v209_v63  ;;  %v225_v14 = vadd.f32 %v224_v6, %v223_v0  ;;  %v316_v15 = vadd.f32 %v315_v7, %v314_v1  ;;  %v2473_v7 = vld [vmem:[#allocation6 + $0x138] sm:$0xff]  }
  0x59   :  { %v322_v17 = vrot.slane %v321_v9, 1  ;;  %v329_v18 = vrot.slane %v328_v10, 1  ;;  %v336_v19 = vrot.slane %v335_v11, 1  ;;  %v63_v43 = vmax.bf16 %v2678_v34, %v55_v40 }
  0x5a   :  { %v443_v20 = vcombine.low %v204_v4, %v211_v13  ;;  %v444_v21 = vcombine.low %v218_v8, %v225_v14  ;;  %v67_v44 = vmax.bf16 %v2678_v34, %v59_v41 }
  0x5b   :  { %v323_v23 = vadd.f32 %v322_v17, %v321_v9  ;;  %v330_v24 = vadd.f32 %v329_v18, %v328_v10  ;;  %v337_v25 = vadd.f32 %v336_v19, %v335_v11  ;;  %v73_v46 = vunpack.c.l.bf16 %v63_v43  ;;  %v2475_v11 = vld [vmem:[#allocation6 + $0x1b8] sm:$0xff]   ;;  %v2477_v18 = vld [vmem:[#allocation6 + $0x130] sm:$0xff]  }
  0x5c   :  { %v451_v26 = vrot.slane %v443_v20, %v2721_v50  ;;  %v458_v28 = vrot.slane %v444_v21, %v2721_v50  ;;  %v74_v47 = vunpack.c.h.bf16 %v63_v43  ;;  %v81_v48 = vunpack.c.l.bf16 %v67_v44  ;;  %v2482_v43 = vld [vmem:[#allocation6 + $0x1e8] sm:$0xff]  }
  0x5d   :  { %v511_v29 = vcombine.low %v316_v15, %v323_v23  ;;  %v512_v30 = vcombine.low %v330_v24, %v337_v25  ;;  %v82_v49 = vunpack.c.h.bf16 %v67_v44  ;;  %v89_v53 = vmul.f32 %v73_v46, %v73_v46 }
  0x5e   :  { %v459_v33 = vcombine.low %v451_v26, %v458_v28  ;;  %v90_v56 = vmul.f32 %v74_v47, %v74_v47  ;;  %v97_v57 = vmul.f32 %v81_v48, %v81_v48  ;;  %v2480_v28 = vld [vmem:[#allocation6 + $0x168] sm:$0xff]  }
  0x5f   :  { %v519_v31 = vrot.slane %v511_v29, %v2721_v50  ;;  %v526_v32 = vrot.slane %v512_v30, %v2721_v50  ;;  %v98_v58 = vmul.f32 %v82_v49, %v82_v49  ;;  %v105_v61 = vmul.f32 %v89_v53, %v73_v46 }
  0x60   :  { %v106_v62 = vmul.f32 %v90_v56, %v74_v47  ;;  %v113_v63 = vmul.f32 %v97_v57, %v81_v48  ;;  %v2483_v48 = vld [vmem:[#allocation6 + $0x1a8] sm:$0xff]   ;;  %v2484_v57 = vld [vmem:[#allocation6 + $0x160] sm:$0xff]  }
  0x61   :  { %v527_v35 = vcombine.low %v519_v31, %v526_v32  ;;  %v114_v0 = vmul.f32 %v98_v58, %v82_v49  ;;  %v141_v2 = vcombine.high %v105_v61, %v105_v61  ;;  %v226_v10 = vsel %vm169_vm0, %v105_v61, 0.0 }
  0x62   :  { %v142_v3 = vcombine.high %v106_v62, %v106_v62  ;;  %v149_v4 = vcombine.high %v113_v63, %v113_v63  ;;  %v227_v13 = vrot.slane %v226_v10, 4  ;;  %v240_v15 = vsel %vm169_vm0, %v106_v62, 0.0  ;;  %v2485_v62 = vld [vmem:[#allocation6 + $0x120] sm:$0xff]  }
  0x63   :  { %v577_v36 = vrot.slane %v527_v35, 7  ;;  %v150_v5 = vcombine.high %v114_v0, %v114_v0  ;;  %v233_v14 = vsel %vm169_vm0, %v141_v2, 0.0  ;;  %v241_v20 = vrot.slane %v240_v15, 4  ;;  %v2488_v2 = vld [vmem:[#allocation6 + $0x158] sm:$0xff]  }
  0x64   :  { %v234_v19 = vrot.slane %v233_v14, 4  ;;  %v228_v23 = vadd.f32 %v227_v13, %v226_v10  ;;  %v338_v24 = vsel %vm169_vm0, %v113_v63, 0.0  ;;  %v345_v25 = vsel %vm169_vm0, %v149_v4, 0.0  ;;  %v2486_v63 = vld [vmem:[#allocation6 + $0x1e0] sm:$0xff]  }
  0x65   :  { %v2569_v12 = vpop.eup %2568  ;;  %v578_v37 = vsel %vm567_vm1, %v577_v36, %v459_v33  ;;  %v352_v26 = vsel %vm169_vm0, %v114_v0, 0.0  ;;  %v242_v30 = vadd.f32 %v241_v20, %v240_v15  ;;  %v339_v32 = vrot.slane %v338_v24, 4 }
  0x66   :  { %v624_v16 = vmul.f32 0.6931472, %v2569_v12  ;;  %v579_v38 = vsel %vm569_vm2, %v577_v36, %v578_v37  ;;  %v2476_v12 = vld [vmem:[#allocation6 + $0x170] sm:$0xff]   ;;  %v235_v29 = vadd.f32 %v234_v19, %v233_v14  ;;  %v229_v33 = vrot.slane %v228_v23, 2 }
  0x67   :  { %v580_v39 = vsel %vm571_vm3, %v577_v36, %v579_v38  ;;  %v346_v35 = vrot.slane %v345_v25, 4  ;;  %v359_v37 = vsel %vm169_vm0, %v150_v5, 0.0  ;;  %v2481_v38 = vld [vmem:[#allocation6 + $0x128] sm:$0xff]   ;;  %v243_v40 = vrot.slane %v242_v30, 2 }
  0x68   :  { %v631_v22 = vmul.f32 0.33333334, %v624_v16  ;;  %v581_v42 = vsel %vm573_vm4, %v577_v36, %v580_v39  ;;  %v247_v16 = vsel %vm169_vm0, %v142_v3, 0.0  ;;  %v353_v36 = vrot.slane %v352_v26, 4 }
  0x69   :  { %v616_v45 = vmul.f32 0.25, %v581_v42  ;;  %v248_v21 = vrot.slane %v247_v16, 4  ;;  %v236_v39 = vrot.slane %v235_v29, 2  ;;  %v340_v42 = vadd.f32 %v339_v32, %v338_v24  ;;  %v2492_v24 = vld [vmem:[#allocation6 + $0x150] sm:$0xff]  }
  0x6a   :  { %v635_v27 = vmul.f32 1.442695, %v631_v22  ;;  %v2478_v22 = vld [vmem:[#allocation6 + $0x1f0] sm:$0xff]   ;;  %v230_v44 = vadd.f32 %v229_v33, %v228_v23  ;;  %v354_v46 = vadd.f32 %v353_v36, %v352_v26  ;;  %v360_v47 = vrot.slane %v359_v37, 4  ;;  %v2496_v33 = vld [vmem:[#allocation6 + $0x148] sm:$0xff]  }
  0x6b   :  { %v620_v51 = vmax.f32 %v616_v45, 1e-18  ;;  %v249_v31 = vadd.f32 %v248_v21, %v247_v16  ;;  %v347_v45 = vadd.f32 %v346_v35, %v345_v25  ;;  %v237_v49 = vadd.f32 %v236_v39, %v235_v29  ;;  %v2489_v16 = vld [vmem:[#allocation6 + $0x118] sm:$0xff]   ;;  %v2493_v29 = vld [vmem:[#allocation6 + $0x110] sm:$0xff]   ;;  %v2497_v39 = vld [vmem:[#allocation6 + $0x108] sm:$0xff]  }
  0x6c   :  { %2570 = vpow2.f32 %v635_v27  ;;  %v2479_v27 = vld [vmem:[#allocation6 + $0x1b0] sm:$0xff]   ;;  %v341_v53 = vrot.slane %v340_v42, 2  ;;  %v231_v58 = vrot.slane %v230_v44, 1  ;;  %v361_v61 = vadd.f32 %v360_v47, %v359_v37  ;;  %v2502_v47 = vld [vmem:[#allocation6 + $0x1c0] sm:$0xff]  }
  0x6d   :  { %2572 = vlog2.f32 %v620_v51  ;;  %v250_v41 = vrot.slane %v249_v31, 2  ;;  %v244_v51 = vadd.f32 %v243_v40, %v242_v30  ;;  %v2494_v30 = vld [vmem:[#allocation6 + $0x1d0] sm:$0xff]   ;;  %v2498_v40 = vld [vmem:[#allocation6 + $0x1c8] sm:$0xff]  }
  0x6e   :  { %v232_v3 = vadd.f32 %v231_v58, %v230_v44  ;;  %v342_v4 = vadd.f32 %v341_v53, %v340_v42  ;;  %v362_v15 = vrot.slane %v361_v61, 2  ;;  %v2495_v32 = vld [vmem:[#allocation6 + $0x190] sm:$0xff]   ;;  %v2499_v42 = vld [vmem:[#allocation6 + $0x188] sm:$0xff]  }
  0x70   :  { %v363_v21 = vadd.f32 %v362_v15, %v361_v61  ;;  %v2508_v15 = vld [vmem:[#allocation6 + $0x270] sm:$0xff]  }
  0x72   :  { %v364_v26 = vrot.slane %v363_v21, 1 }
  0x79   :  { %v2571_v52 = vpop.eup %2570 }
  0x7a   :  { %v658_v59 = vrot.slane %v2571_v52, %v2721_v50  ;;  %643 = vst [vmem:[#allocation8] sm:$0xff] %v2571_v52  ;;  %v651_v60 = vcombine.high %v2571_v52, %v2571_v52  ;;  %v251_v52 = vadd.f32 %v250_v41, %v249_v31  ;;  %v2573_v56 = vpop.eup %2572  ;;  %v365_v31 = vadd.f32 %v364_v26, %v363_v21  ;;  %v2507_v21 = vld [vmem:[#allocation6 + $0x2b8] sm:$0xff]  }
  0x7b   :  { %v626_v0 = vmul.f32 0.6931472, %v2573_v56  ;;  %v2504_v56 = vld [vmem:[#allocation6 + $0x278] sm:$0xff]  }
  0x7c   :  { %v666_v1 = vcombine.high %v658_v59, %v658_v59  ;;  %v735_v54 = vpack.c.bf16 %v658_v59, %v658_v59  ;;  %v665_v55 = vrot.slane %v651_v60, %v2721_v50  ;;  %v348_v59 = vrot.slane %v347_v45, 2 }
  0x7d   :  { %v355_v60 = vrot.slane %v354_v46, 2 }
  0x7e   :  { %v736_v6 = vpack.c.bf16 %v666_v1, %v666_v1  ;;  %v667_v8 = vcombine.high %v665_v55, %v665_v55  ;;  %v737_v9 = vpack.c.bf16 %v665_v55, %v665_v55  ;;  %v238_v1 = vrot.slane %v237_v49, 1 }
  0x7f   :  { %v252_v55 = vrot.slane %v251_v52, 1  ;;  %v349_v5 = vadd.f32 %v348_v59, %v347_v45 }
  0x80   :  { %1807 = vmatprep.mubr.bf16.mxu0 %v736_v6  ;;  %v738_v17 = vpack.c.bf16 %v667_v8, %v667_v8  ;;  %v356_v6 = vadd.f32 %v355_v60, %v354_v46  ;;  %v632_v8 = vmul.f32 0.33333334, %v626_v0  ;;  %v2501_v46 = vld [vmem:[#allocation6 + $0x100] sm:$0xff]   ;;  %v2506_v0 = vld [vmem:[#allocation6 + $0x2f8] sm:$0xff]  }
  0x81   :  { %1808 = vmatmul.mubr.bf16.vlgmr.msra.gmra.mxu0 %v735_v54  ;;  %v245_v54 = vrot.slane %v244_v51, 1  ;;  %v350_v13 = vrot.slane %v349_v5, 1  ;;  %v2503_v60 = vld [vmem:[#allocation6 + $0x180] sm:$0xff]  }
  0x82   :  { %2299 = vmatpush3.bf16.msra.mxu0 %v2473_v7  ;;  %1847 = vmatprep.mubr.bf16.mxu1 %v738_v17  ;;  %v2487_v7 = vld [vmem:[#allocation6 + $0x1a0] sm:$0xff]   ;;  %v357_v14 = vrot.slane %v356_v6, 1  ;;  %v637_v17 = vmul.f32 1.442695, %v632_v8 }
  0x83   :  { %1848 = vmatmul.mubr.bf16.vlgmr.msra.gmra.mxu1 %v737_v9  ;;  %2300 = vmatprep.subr.bf16.mxu0 %v2476_v12  ;;  %v239_v9 = vadd.f32 %v238_v1, %v237_v49  ;;  %v246_v10 = vadd.f32 %v245_v54, %v244_v51  ;;  %v343_v12 = vrot.slane %v342_v4, 1  ;;  %v351_v20 = vadd.f32 %v350_v13, %v349_v5  ;;  %v56_v49 = vld [vmem:[#allocation3 + $0x18] sm:$0xff] }
  0x84   :  { %2321 = vmatpush3.bf16.msra.mxu1 %v2475_v11  ;;  %v253_v11 = vadd.f32 %v252_v55, %v251_v52  ;;  %2574 = vpow2.f32 %v637_v17  ;;  %v358_v25 = vadd.f32 %v357_v14, %v356_v6  ;;  %v60_v51 = vld [vmem:[#allocation3 + $0x38] sm:$0xff]  ;;  %v64_v52 = vmax.bf16 %v2678_v34, %v56_v49 }
  0x85   :  { %2322 = vmatprep.subr.bf16.mxu1 %v2478_v22  ;;  %v344_v19 = vadd.f32 %v343_v12, %v342_v4  ;;  %v2491_v22 = vld [vmem:[#allocation6 + $0x198] sm:$0xff]   ;;  %v460_v23 = vcombine.low %v232_v3, %v239_v9  ;;  %v68_v58 = vmax.bf16 %v2678_v34, %v60_v51 }
  0x86   :  { %2301 = vmatpush3.bf16.msra.mxu0 %v2477_v18  ;;  %v2490_v18 = vld [vmem:[#allocation6 + $0x1d8] sm:$0xff]   ;;  %v529_v37 = vcombine.low %v358_v25, %v365_v31  ;;  %v76_v54 = vunpack.c.h.bf16 %v64_v52 }
  0x87   :  { %2302 = vmatprep.subr.bf16.mxu0 %v2480_v28  ;;  %v528_v28 = vcombine.low %v344_v19, %v351_v20  ;;  %v468_v35 = vrot.slane %v460_v23, %v2721_v50  ;;  %v83_v55 = vunpack.c.l.bf16 %v68_v58  ;;  %v2505_v12 = vld [vmem:[#allocation6 + $0x238] sm:$0xff]   ;;  %v2510_v23 = vld [vmem:[#allocation6 + $0x2f0] sm:$0xff]  }
  0x88   :  { %2323 = vmatpush3.bf16.msra.mxu1 %v2479_v27  ;;  %v461_v27 = vcombine.low %v246_v10, %v253_v11  ;;  %v543_v41 = vrot.slane %v529_v37, %v2721_v50  ;;  %v92_v8 = vmul.f32 %v76_v54, %v76_v54 }
  0x89   :  { %2324 = vmatprep.subr.bf16.mxu1 %v2482_v43  ;;  %v2500_v43 = vld [vmem:[#allocation6 + $0x140] sm:$0xff]   ;;  %v99_v9 = vmul.f32 %v83_v55, %v83_v55 }
  0x8a   :  { %2303 = vmatpush3.bf16.msra.mxu0 %v2481_v38  ;;  %v475_v36 = vrot.slane %v461_v27, %v2721_v50  ;;  %v536_v38 = vrot.slane %v528_v28, %v2721_v50  ;;  %v2509_v27 = vld [vmem:[#allocation6 + $0x230] sm:$0xff]  }
  0x8b   :  { %2304 = vmatprep.subr.bf16.mxu0 %v2484_v57  ;;  %v115_v19 = vmul.f32 %v99_v9, %v83_v55  ;;  %v2520_v9 = vld [vmem:[#allocation6 + $0x258] sm:$0xff]  }
  0x8c   :  { %2325 = vmatpush3.bf16.msra.mxu1 %v2483_v48  ;;  %v476_v44 = vcombine.low %v468_v35, %v475_v36  ;;  %v544_v45 = vcombine.low %v536_v38, %v543_v41  ;;  %v2511_v38 = vld [vmem:[#allocation6 + $0x2b0] sm:$0xff]  }
  0x8d   :  { %2326 = vmatprep.subr.bf16.mxu1 %v2486_v63  ;;  %v75_v63 = vunpack.c.l.bf16 %v64_v52  ;;  %v151_v26 = vcombine.high %v115_v19, %v115_v19  ;;  %v366_v31 = vsel %vm169_vm0, %v115_v19, 0.0  ;;  %v2522_v19 = vld [vmem:[#allocation6 + $0x2d8] sm:$0xff]  }
  0x8e   :  { %2305 = vmatpush3.bf16.msra.mxu0 %v2485_v62  ;;  %v584_v48 = vrot.slane %v544_v45, 7  ;;  %v367_v41 = vrot.slane %v366_v31, 4 }
  0x8f   :  { %2306 = vmatprep.subr.bf16.mxu0 %v2488_v2  ;;  %v84_v2 = vunpack.c.h.bf16 %v68_v58 }
  0x90   :  { %2327 = vmatpush3.bf16.msra.mxu1 %v2487_v7  ;;  %v585_v57 = vsel %vm567_vm1, %v584_v48, %v476_v44  ;;  %v91_v7 = vmul.f32 %v75_v63, %v75_v63  ;;  %v368_v52 = vadd.f32 %v367_v41, %v366_v31 }
  0x91   :  { %2328 = vmatprep.subr.bf16.mxu1 %v2490_v18  ;;  %v2575_v53 = vpop.eup %2574  ;;  %v586_v62 = vsel %vm569_vm2, %v584_v48, %v585_v57  ;;  %v100_v14 = vmul.f32 %v84_v2, %v84_v2  ;;  %v108_v18 = vmul.f32 %v92_v8, %v76_v54  ;;  %v2518_v54 = vld [vmem:[#allocation6 + $0x2e0] sm:$0xff]  }
  0x92   :  { %2307 = vmatpush3.bf16.msra.mxu0 %v2489_v16  ;;  %v675_v59 = vrot.slane %v2575_v53, %v2721_v50  ;;  %644 = vst [vmem:[#allocation8 + $0x8] sm:$0xff] %v2575_v53  ;;  %v668_v61 = vcombine.high %v2575_v53, %v2575_v53  ;;  %v587_v1 = vsel %vm571_vm3, %v584_v48, %v586_v62 }
  0x93   :  { %2308 = vmatprep.subr.bf16.mxu0 %v2492_v24  ;;  %v588_v5 = vsel %vm573_vm4, %v584_v48, %v587_v1  ;;  %v107_v17 = vmul.f32 %v91_v7, %v75_v63  ;;  %v144_v25 = vcombine.high %v108_v18, %v108_v18  ;;  %v2513_v48 = vld [vmem:[#allocation6 + $0x228] sm:$0xff]  }
  0x94   :  { %2329 = vmatpush3.bf16.msra.mxu1 %v2491_v22  ;;  %v683_v3 = vcombine.high %v675_v59, %v675_v59  ;;  %v739_v4 = vpack.c.bf16 %v675_v59, %v675_v59  ;;  %v682_v34 = vrot.slane %v668_v61, %v2721_v50  ;;  %v617_v6 = vmul.f32 0.25, %v588_v5  ;;  %v2515_v61 = vld [vmem:[#allocation6 + $0x2a8] sm:$0xff]  }
  0x95   :  { %2330 = vmatprep.subr.bf16.mxu1 %v2494_v30  ;;  %v116_v22 = vmul.f32 %v100_v14, %v84_v2  ;;  %v143_v24 = vcombine.high %v107_v17, %v107_v17  ;;  %v268_v30 = vsel %vm169_vm0, %v108_v18, 0.0  ;;  %v275_v37 = vsel %vm169_vm0, %v144_v25, 0.0  ;;  %v2519_v14 = vld [vmem:[#allocation6 + $0x2a0] sm:$0xff]   ;;  %v2521_v25 = vld [vmem:[#allocation6 + $0x218] sm:$0xff]  }
  0x96   :  { %2309 = vmatpush3.bf16.msra.mxu0 %v2493_v29  ;;  %v740_v10 = vpack.c.bf16 %v683_v3, %v683_v3  ;;  %v684_v11 = vcombine.high %v682_v34, %v682_v34  ;;  %v741_v13 = vpack.c.bf16 %v682_v34, %v682_v34  ;;  %v621_v16 = vmax.f32 %v617_v6, 1e-18  ;;  %v2517_v34 = vld [vmem:[#allocation6 + $0x220] sm:$0xff]  }
  0x97   :  { %2310 = vmatprep.subr.bf16.mxu0 %v2496_v33  ;;  %v152_v28 = vcombine.high %v116_v22, %v116_v22  ;;  %v254_v29 = vsel %vm169_vm0, %v107_v17, 0.0  ;;  %v261_v35 = vsel %vm169_vm0, %v143_v24, 0.0  ;;  %v269_v36 = vrot.slane %v268_v30, 4 }
  0x98   :  { %2331 = vmatpush3.bf16.msra.mxu1 %v2495_v32  ;;  %1887 = vmatprep.mubr.bf16.mxu0 %v740_v10  ;;  %v742_v20 = vpack.c.bf16 %v684_v11, %v684_v11  ;;  %2576 = vlog2.f32 %v621_v16  ;;  %v2512_v32 = vld [vmem:[#allocation6 + $0x268] sm:$0xff]   ;;  %v255_v33 = vrot.slane %v254_v29, 4 }
  0x99   :  { %2332 = vmatprep.subr.bf16.mxu1 %v2498_v40  ;;  %v276_v40 = vrot.slane %v275_v37, 4  ;;  %v270_v45 = vadd.f32 %v269_v36, %v268_v30  ;;  %v2524_v30 = vld [vmem:[#allocation6 + $0x250] sm:$0xff]  }
  0x9a   :  { %2311 = vmatpush3.bf16.msra.mxu0 %v2497_v39  ;;  %1927 = vmatprep.mubr.bf16.mxu1 %v742_v20  ;;  %v262_v39 = vrot.slane %v261_v35, 4  ;;  %v256_v44 = vadd.f32 %v255_v33, %v254_v29 }
  0x9b   :  { %2312 = vmatprep.subr.bf16.mxu0 %v2500_v43  ;;  %v2514_v43 = vld [vmem:[#allocation6 + $0x2e8] sm:$0xff]   ;;  %v277_v51 = vadd.f32 %v276_v40, %v275_v37  ;;  %v271_v58 = vrot.slane %v270_v45, 2 }
  0x9c   :  { %2333 = vmatpush3.bf16.msra.mxu1 %v2499_v42  ;;  %v373_v42 = vsel %vm169_vm0, %v151_v26, 0.0  ;;  %v263_v49 = vadd.f32 %v262_v39, %v261_v35  ;;  %v257_v57 = vrot.slane %v256_v44, 2  ;;  %v2523_v35 = vld [vmem:[#allocation6 + $0x298] sm:$0xff]  }
  0x9d   :  { %2334 = vmatprep.subr.bf16.mxu1 %v2502_v47  ;;  %v380_v47 = vsel %vm169_vm0, %v116_v22, 0.0  ;;  %v278_v63 = vrot.slane %v277_v51, 2  ;;  %v272_v2 = vadd.f32 %v271_v58, %v270_v45 }
  0x9e   :  { %2313 = vmatpush3.bf16.msra.mxu0 %v2501_v46  ;;  %v374_v46 = vrot.slane %v373_v42, 4  ;;  %v381_v53 = vrot.slane %v380_v47, 4  ;;  %v264_v62 = vrot.slane %v263_v49, 2  ;;  %v258_v55 = vadd.f32 %v257_v57, %v256_v44  ;;  %v2528_v44 = vld [vmem:[#allocation6 + $0x248] sm:$0xff]   ;;  %v2532_v57 = vld [vmem:[#allocation6 + $0x240] sm:$0xff]  }
  0x9f   :  { %2342 = vmatprep.subr.bf16.mxu0 %v2504_v56  ;;  %v2516_v56 = vld [vmem:[#allocation6 + $0x260] sm:$0xff]   ;;  %v279_v6 = vadd.f32 %v278_v63, %v277_v51  ;;  %v273_v11 = vrot.slane %v272_v2, 1 }
  0xa0   :  { %2335 = vmatpush3.bf16.msra.mxu1 %v2503_v60  ;;  %v375_v59 = vadd.f32 %v374_v46, %v373_v42  ;;  %v387_v60 = vsel %vm169_vm0, %v152_v28, 0.0  ;;  %v382_v1 = vadd.f32 %v381_v53, %v380_v47  ;;  %v265_v5 = vadd.f32 %v264_v62, %v263_v49  ;;  %v2527_v47 = vld [vmem:[#allocation6 + $0x290] sm:$0xff]   ;;  %v2530_v49 = vld [vmem:[#allocation6 + $0x2c8] sm:$0xff]   ;;  %v2533_v63 = vld [vmem:[#allocation6 + $0x200] sm:$0xff]  }
  0xa1   :  { %2364 = vmatprep.subr.bf16.mxu1 %v2506_v0  ;;  %1888 = vmatmul.mubr.bf16.vlgmr.msra.gmra.mxu0 %v739_v4  ;;  %v369_v0 = vrot.slane %v368_v52, 2  ;;  %v388_v4 = vrot.slane %v387_v60, 4  ;;  %v259_v10 = vrot.slane %v258_v55, 1  ;;  %v280_v16 = vrot.slane %v279_v6, 1 }
  0xa2   :  { %2343 = vmatpush3.bf16.msra.mxu0 %v2505_v12  ;;  %v376_v3 = vrot.slane %v375_v59, 2  ;;  %v383_v8 = vrot.slane %v382_v1, 2 }
  0xa3   :  { %1928 = vmatmul.mubr.bf16.vlgmr.msra.gmra.mxu1 %v741_v13  ;;  %2344 = vmatprep.subr.bf16.mxu0 %v2508_v15  ;;  %v370_v7 = vadd.f32 %v369_v0, %v368_v52  ;;  %v389_v13 = vadd.f32 %v388_v4, %v387_v60  ;;  %v266_v15 = vrot.slane %v265_v5, 1  ;;  %v260_v20 = vadd.f32 %v259_v10, %v258_v55  ;;  %v2534_v60 = vld [vmem:[#allocation6 + $0x2c0] sm:$0xff]   ;;  %v2536_v0 = vld [vmem:[#allocation6 + $0x378] sm:$0xff]  }
  0xa4   :  { %2365 = vmatpush3.bf16.msra.mxu1 %v2507_v21  ;;  %v377_v12 = vadd.f32 %v376_v3, %v375_v59  ;;  %v384_v18 = vadd.f32 %v383_v8, %v382_v1  ;;  %v274_v21 = vadd.f32 %v273_v11, %v272_v2  ;;  %v2531_v59 = vld [vmem:[#allocation6 + $0x288] sm:$0xff]   ;;  %v2538_v55 = vld [vmem:[#allocation6 + $0x3f8] sm:$0xff]  }
  0xa5   :  { %2366 = vmatprep.subr.bf16.mxu1 %v2510_v23  ;;  %v371_v17 = vrot.slane %v370_v7, 1  ;;  %v390_v23 = vrot.slane %v389_v13, 2  ;;  %v2577_v24 = vpop.eup %2576  ;;  %v267_v26 = vadd.f32 %v266_v15, %v265_v5  ;;  %v2537_v15 = vld [vmem:[#allocation6 + $0x338] sm:$0xff]  }
  0xa6   :  { %2345 = vmatpush3.bf16.msra.mxu0 %v2509_v27  ;;  %v378_v22 = vrot.slane %v377_v12, 1  ;;  %v281_v27 = vadd.f32 %v280_v16, %v279_v6  ;;  %v385_v29 = vrot.slane %v384_v18, 1  ;;  %v628_v31 = vmul.f32 0.6931472, %v2577_v24  ;;  %v2546_v24 = vld [vmem:[#allocation6 + $0x3e8] sm:$0xff]  }
  0xa7   :  { %2346 = vmatprep.subr.bf16.mxu0 %v2512_v32  ;;  %v372_v28 = vadd.f32 %v371_v17, %v370_v7  ;;  %v391_v33 = vadd.f32 %v390_v23, %v389_v13  ;;  %v477_v37 = vcombine.low %v260_v20, %v267_v26  ;;  %v2540_v17 = vld [vmem:[#allocation6 + $0x370] sm:$0xff]   ;;  %v2548_v26 = vld [vmem:[#allocation6 + $0x360] sm:$0xff]  }
  0xa8   :  { %2367 = vmatpush3.bf16.msra.mxu1 %v2511_v38  ;;  %v379_v32 = vadd.f32 %v378_v22, %v377_v12  ;;  %v386_v36 = vadd.f32 %v385_v29, %v384_v18  ;;  %v2526_v38 = vld [vmem:[#allocation6 + $0x2d0] sm:$0xff]   ;;  %v633_v39 = vmul.f32 0.33333334, %v628_v31  ;;  %v478_v41 = vcombine.low %v274_v21, %v281_v27  ;;  %v2544_v22 = vld [vmem:[#allocation6 + $0x368] sm:$0xff]   ;;  %v2550_v29 = vld [vmem:[#allocation6 + $0x3e0] sm:$0xff]  }
  0xa9   :  { %2368 = vmatprep.subr.bf16.mxu1 %v2514_v43  ;;  %v392_v40 = vrot.slane %v391_v33, 1  ;;  %v2525_v43 = vld [vmem:[#allocation6 + $0x210] sm:$0xff]   ;;  %v2547_v27 = vld [vmem:[#allocation6 + $0x3a8] sm:$0xff]  }
  0xaa   :  { %2347 = vmatpush3.bf16.msra.mxu0 %v2513_v48  ;;  %v545_v42 = vcombine.low %v372_v28, %v379_v32  ;;  %v639_v45 = vmul.f32 1.442695, %v633_v39  ;;  %v485_v48 = vrot.slane %v477_v37, %v2721_v50  ;;  %v492_v51 = vrot.slane %v478_v41, %v2721_v50  ;;  %v2542_v20 = vld [vmem:[#allocation6 + $0x3f0] sm:$0xff]   ;;  %v2552_v32 = vld [vmem:[#allocation6 + $0x358] sm:$0xff]  }
  0xab   :  { %2348 = vmatprep.subr.bf16.mxu0 %v2516_v56  ;;  %v393_v46 = vadd.f32 %v392_v40, %v391_v33  ;;  %v2529_v56 = vld [vmem:[#allocation6 + $0x208] sm:$0xff]   ;;  %v2541_v21 = vld [vmem:[#allocation6 + $0x330] sm:$0xff]   ;;  %v2551_v33 = vld [vmem:[#allocation6 + $0x3a0] sm:$0xff]  }
  0xac   :  { %2369 = vmatpush3.bf16.msra.mxu1 %v2515_v61  ;;  %2578 = vpow2.f32 %v639_v45  ;;  %v553_v53 = vrot.slane %v545_v42, %v2721_v50  ;;  %v493_v61 = vcombine.low %v485_v48, %v492_v51  ;;  %v2543_v23 = vld [vmem:[#allocation6 + $0x3b0] sm:$0xff]   ;;  %v2553_v37 = vld [vmem:[#allocation6 + $0x318] sm:$0xff]   ;;  %v2562_v45 = vld [vmem:[#allocation6 + $0x3c8] sm:$0xff]  }
  0xad   :  { %2370 = vmatprep.subr.bf16.mxu1 %v2518_v54  ;;  %v546_v52 = vcombine.low %v386_v36, %v393_v46  ;;  %v2535_v54 = vld [vmem:[#allocation6 + $0x280] sm:$0xff]   ;;  %v2554_v36 = vld [vmem:[#allocation6 + $0x3d8] sm:$0xff]   ;;  %v2556_v39 = vld [vmem:[#allocation6 + $0x350] sm:$0xff]  }
  0xae   :  { %2349 = vmatpush3.bf16.msra.mxu0 %v2517_v34  ;;  %v2555_v40 = vld [vmem:[#allocation6 + $0x398] sm:$0xff]   ;;  %v2558_v41 = vld [vmem:[#allocation6 + $0x3d0] sm:$0xff]   ;;  %v2561_v46 = vld [vmem:[#allocation6 + $0x308] sm:$0xff]  }
  0xaf   :  { %2350 = vmatprep.subr.bf16.mxu0 %v2520_v9  ;;  %v560_v58 = vrot.slane %v546_v52, %v2721_v50  ;;  %v2557_v42 = vld [vmem:[#allocation6 + $0x310] sm:$0xff]   ;;  %v2563_v48 = vld [vmem:[#allocation6 + $0x388] sm:$0xff]   ;;  %v2565_v51 = vld [vmem:[#allocation6 + $0x300] sm:$0xff]  }
  0xb0   :  { %2371 = vmatpush3.bf16.msra.mxu1 %v2519_v14  ;;  %v2567_v52 = vld [vmem:[#allocation6 + $0x380] sm:$0xff]  }
  0xb1   :  { %2372 = vmatprep.subr.bf16.mxu1 %v2522_v19  ;;  %v561_v62 = vcombine.low %v553_v53, %v560_v58  ;;  %v2539_v19 = vld [vmem:[#allocation6 + $0x3b8] sm:$0xff]  }
  0xb2   :  { %2351 = vmatpush3.bf16.msra.mxu0 %v2521_v25  ;;  %v2545_v25 = vld [vmem:[#allocation6 + $0x328] sm:$0xff]  }
  0xb3   :  { %2352 = vmatprep.subr.bf16.mxu0 %v2524_v30  ;;  %v591_v1 = vrot.slane %v561_v62, 7  ;;  %v2549_v30 = vld [vmem:[#allocation6 + $0x320] sm:$0xff]  }
  0xb4   :  { %2373 = vmatpush3.bf16.msra.mxu1 %v2523_v35 }
  0xb5   :  { %2374 = vmatprep.subr.bf16.mxu1 %v2526_v38  ;;  %v592_v2 = vsel %vm567_vm1, %v591_v1, %v493_v61 }
  0xb6   :  { %2353 = vmatpush3.bf16.msra.mxu0 %v2525_v43  ;;  %v593_v3 = vsel %vm569_vm2, %v591_v1, %v592_v2  ;;  %v2560_v43 = vld [vmem:[#allocation6 + $0x348] sm:$0xff]  }
  0xb7   :  { %2354 = vmatprep.subr.bf16.mxu0 %v2528_v44  ;;  %v594_v4 = vsel %vm571_vm3, %v591_v1, %v593_v3  ;;  %v2559_v44 = vld [vmem:[#allocation6 + $0x390] sm:$0xff]  }
  0xb8   :  { %2375 = vmatpush3.bf16.msra.mxu1 %v2527_v47  ;;  %v595_v34 = vsel %vm573_vm4, %v591_v1, %v594_v4  ;;  %v2564_v47 = vld [vmem:[#allocation6 + $0x340] sm:$0xff]  }
  0xb9   :  { %2376 = vmatprep.subr.bf16.mxu1 %v2530_v49  ;;  %v618_v5 = vmul.f32 0.25, %v595_v34  ;;  %v2579_v6 = vpop.eup %2578  ;;  %v2566_v49 = vld [vmem:[#allocation6 + $0x3c0] sm:$0xff]  }
  0xba   :  { %2355 = vmatpush3.bf16.msra.mxu0 %v2529_v56  ;;  %v692_v7 = vrot.slane %v2579_v6, %v2721_v50  ;;  %645 = vst [vmem:[#allocation8 + $0x10] sm:$0xff] %v2579_v6  ;;  %v685_v8 = vcombine.high %v2579_v6, %v2579_v6 }
  0xbb   :  { %2356 = vmatprep.subr.bf16.mxu0 %v2532_v57  ;;  %v622_v9 = vmax.f32 %v618_v5, 1e-18 }
  0xbc   :  { %2377 = vmatpush3.bf16.msra.mxu1 %v2531_v59  ;;  %v700_v10 = vcombine.high %v692_v7, %v692_v7  ;;  %v699_v11 = vrot.slane %v685_v8, %v2721_v50  ;;  %v743_v12 = vpack.c.bf16 %v692_v7, %v692_v7 }
  0xbd   :  { %2378 = vmatprep.subr.bf16.mxu1 %v2534_v60  ;;  %2580 = vlog2.f32 %v622_v9 }
  0xbe   :  { %2357 = vmatpush3.bf16.msra.mxu0 %v2533_v63  ;;  %v744_v13 = vpack.c.bf16 %v700_v10, %v700_v10  ;;  %v701_v14 = vcombine.high %v699_v11, %v699_v11  ;;  %v745_v16 = vpack.c.bf16 %v699_v11, %v699_v11 }
  0xbf   :  { %2386 = vmatprep.subr.bf16.mxu0 %v2536_v0 }
  0xc0   :  { %2379 = vmatpush3.bf16.msra.mxu1 %v2535_v54  ;;  %1967 = vmatprep.mubr.bf16.mxu0 %v744_v13  ;;  %v746_v18 = vpack.c.bf16 %v701_v14, %v701_v14 }
  0xc1   :  { %2408 = vmatprep.subr.bf16.mxu1 %v2538_v55  ;;  %1968 = vmatmul.mubr.bf16.vlgmr.msra.gmra.mxu0 %v743_v12 }
  0xc2   :  { %2007 = vmatprep.mubr.bf16.mxu1 %v746_v18  ;;  %2387 = vmatpush3.bf16.msra.mxu0 %v2537_v15 }
  0xc3   :  { %2008 = vmatmul.mubr.bf16.vlgmr.msra.gmra.mxu1 %v745_v16  ;;  %2388 = vmatprep.subr.bf16.mxu0 %v2540_v17 }
  0xc4   :  { %2409 = vmatpush3.bf16.msra.mxu1 %v2539_v19 }
  0xc5   :  { %2410 = vmatprep.subr.bf16.mxu1 %v2542_v20 }
  0xc6   :  { %2389 = vmatpush3.bf16.msra.mxu0 %v2541_v21 }
  0xc7   :  { %2390 = vmatprep.subr.bf16.mxu0 %v2544_v22 }
  0xc8   :  { %2411 = vmatpush3.bf16.msra.mxu1 %v2543_v23 }
  0xc9   :  { %2412 = vmatprep.subr.bf16.mxu1 %v2546_v24 }
  0xca   :  { %v2581_v28 = vpop.eup %2580  ;;  %2391 = vmatpush3.bf16.msra.mxu0 %v2545_v25 }
  0xcb   :  { %v630_v31 = vmul.f32 0.6931472, %v2581_v28  ;;  %2392 = vmatprep.subr.bf16.mxu0 %v2548_v26 }
  0xcc   :  { %2413 = vmatpush3.bf16.msra.mxu1 %v2547_v27 }
  0xcd   :  { %v634_v35 = vmul.f32 0.33333334, %v630_v31  ;;  %2414 = vmatprep.subr.bf16.mxu1 %v2550_v29 }
  0xce   :  { %2393 = vmatpush3.bf16.msra.mxu0 %v2549_v30 }
  0xcf   :  { %v641_v38 = vmul.f32 1.442695, %v634_v35  ;;  %2394 = vmatprep.subr.bf16.mxu0 %v2552_v32 }
  0xd0   :  { %2415 = vmatpush3.bf16.msra.mxu1 %v2551_v33 }
  0xd1   :  { %2582 = vpow2.f32 %v641_v38  ;;  %2416 = vmatprep.subr.bf16.mxu1 %v2554_v36 }
  0xd2   :  { %2395 = vmatpush3.bf16.msra.mxu0 %v2553_v37 }
  0xd3   :  { %2396 = vmatprep.subr.bf16.mxu0 %v2556_v39 }
  0xd4   :  { %2417 = vmatpush3.bf16.msra.mxu1 %v2555_v40 }
  0xd5   :  { %2418 = vmatprep.subr.bf16.mxu1 %v2558_v41 }
  0xd6   :  { %2397 = vmatpush3.bf16.msra.mxu0 %v2557_v42 }
  0xd7   :  { %2398 = vmatprep.subr.bf16.mxu0 %v2560_v43 }
  0xd8   :  { %2419 = vmatpush3.bf16.msra.mxu1 %v2559_v44 }
  0xd9   :  { %2420 = vmatprep.subr.bf16.mxu1 %v2562_v45 }
  0xda   :  { %2399 = vmatpush3.bf16.msra.mxu0 %v2561_v46 }
  0xdb   :  { %2400 = vmatprep.subr.bf16.mxu0 %v2564_v47 }
  0xdc   :  { %2421 = vmatpush3.bf16.msra.mxu1 %v2563_v48 }
  0xdd   :  { %2422 = vmatprep.subr.bf16.mxu1 %v2566_v49 }
  0xde   :  { %v2583_v53 = vpop.eup %2582  ;;  %2401 = vmatpush3.bf16.msra.mxu0 %v2565_v51 }
  0xdf   :  { %v709_v56 = vrot.slane %v2583_v53, %v2721_v50  ;;  %646 = vst [vmem:[#allocation8 + $0x18] sm:$0xff] %v2583_v53  ;;  %v702_v57 = vcombine.high %v2583_v53, %v2583_v53 }
  0xe0   :  { %2423 = vmatpush3.bf16.msra.mxu1 %v2567_v52 }
  0xe1   :  { %v717_v58 = vcombine.high %v709_v56, %v709_v56  ;;  %v716_v59 = vrot.slane %v702_v57, %v2721_v50  ;;  %v747_v60 = vpack.c.bf16 %v709_v56, %v709_v56 }
  0xe3   :  { %v748_v61 = vpack.c.bf16 %v717_v58, %v717_v58  ;;  %v718_v62 = vcombine.high %v716_v59, %v716_v59  ;;  %v749_v63 = vpack.c.bf16 %v716_v59, %v716_v59 }
  0xe5   :  { %2047 = vmatprep.mubr.bf16.mxu0 %v748_v61  ;;  %v750_v0 = vpack.c.bf16 %v718_v62, %v718_v62 }
  0xe6   :  { %2048 = vmatmul.mubr.bf16.vlgmr.msra.gmra.mxu0 %v747_v60 }
  0xe7   :  { %2087 = vmatprep.mubr.bf16.mxu1 %v750_v0 }
  0xe8   :  { %2088 = vmatmul.mubr.bf16.vlgmr.msra.gmra.mxu1 %v749_v63 }
  0xe9   :  { %2635 = shalt.err (!%p2632_p0)
}
  0xea   :  { %2105 = dma.vmem_to_hbm [thread:$0]  %s2103_s1, 512, %s2801_s2, [#allocation5]  }
  0xeb   :  { %s2681_s2 = smov [#allocation9]  }
  0xec   :  { %s2112_s29 = sshll.u32 %s2681_s2, 4  ;;  %s2113_s29 = int_to_ptr.vmem [resolvable:$true] %s2112_s29 }
  0xed   :  { %s2644_s30 = scalar_lea.vmem %s2113_s29, 32  ;;  %p2649_p2 = scmp.lt.s32.totalorder %s2113_s29, %s2113_s29 }
  0xee   :  { %p2645_p1 = scmp.ne.s32.totalorder %s2113_s29, %s2644_s30  ;;  %p2650_p3 = scmp.lt.s32.totalorder %s2644_s30, %s2644_s30 }
  0xf0   :  { %p2651_p4 = por %p2650_p3, %p2649_p2 }
  0xf2   :  { %p2652_p5 = pnand %p2651_p4, %p2645_p1 }
 0x141   :  { %v2270_v50 = vpop.f32.mrf.mxu0 }
 0x143   :  { %v2271_v1 = vpop.f32.mrf.mxu0  ;;  %v2292_v54 = vpop.f32.mrf.mxu1 }
 0x144   :  { %v2272_v55 = vadd.f32 %v2271_v1, %v2270_v50 }
 0x145   :  { %v2273_v2 = vpop.f32.mrf.mxu0  ;;  %v2293_v3 = vpop.f32.mrf.mxu1 }
 0x146   :  { %v2294_v4 = vadd.f32 %v2293_v3, %v2292_v54 }
 0x147   :  { %v2274_v34 = vpop.f32.mrf.mxu0  ;;  %v2295_v5 = vpop.f32.mrf.mxu1 }
 0x148   :  { %v1850_v6 = vadd.f32 %v2294_v4, %v2272_v55 }
 0x149   :  { %v2296_v7 = vpop.f32.mrf.mxu1 }
 0x161   :  { %v2314_v8 = vpop.f32.mrf.mxu0 }
 0x163   :  { %v2315_v9 = vpop.f32.mrf.mxu0  ;;  %v2336_v10 = vpop.f32.mrf.mxu1 }
 0x164   :  { %v2316_v11 = vadd.f32 %v2315_v9, %v2314_v8 }
 0x165   :  { %v2317_v12 = vpop.f32.mrf.mxu0  ;;  %v2337_v13 = vpop.f32.mrf.mxu1 }
 0x166   :  { %v1890_v14 = vadd.f32 %v2316_v11, %v1850_v6  ;;  %v2338_v15 = vadd.f32 %v2337_v13, %v2336_v10 }
 0x167   :  { %v2318_v16 = vpop.f32.mrf.mxu0  ;;  %v2339_v17 = vpop.f32.mrf.mxu1 }
 0x168   :  { %v1930_v18 = vadd.f32 %v2338_v15, %v1890_v14 }
 0x169   :  { %v2340_v19 = vpop.f32.mrf.mxu1 }
 0x181   :  { %v2358_v20 = vpop.f32.mrf.mxu0 }
 0x183   :  { %v2359_v21 = vpop.f32.mrf.mxu0  ;;  %v2380_v22 = vpop.f32.mrf.mxu1 }
 0x184   :  { %v2360_v28 = vadd.f32 %v2359_v21, %v2358_v20 }
 0x185   :  { %v2361_v23 = vpop.f32.mrf.mxu0  ;;  %v2381_v24 = vpop.f32.mrf.mxu1 }
 0x186   :  { %v1970_v29 = vadd.f32 %v2360_v28, %v1930_v18  ;;  %v2382_v30 = vadd.f32 %v2381_v24, %v2380_v22 }
 0x187   :  { %v2362_v25 = vpop.f32.mrf.mxu0  ;;  %v2383_v26 = vpop.f32.mrf.mxu1 }
 0x188   :  { %v2010_v35 = vadd.f32 %v2382_v30, %v1970_v29 }
 0x189   :  { %v2384_v27 = vpop.f32.mrf.mxu1 }
 0x1a6   :  { %v2402_v31 = vpop.f32.mrf.mxu0 }
 0x1a8   :  { %v2403_v32 = vpop.f32.mrf.mxu0  ;;  %v2424_v33 = vpop.f32.mrf.mxu1 }
 0x1a9   :  { %v2404_v36 = vadd.f32 %v2403_v32, %v2402_v31 }
 0x1aa   :  { %v2405_v37 = vpop.f32.mrf.mxu0  ;;  %v2425_v38 = vpop.f32.mrf.mxu1 }
 0x1ab   :  { %v2050_v39 = vadd.f32 %v2404_v36, %v2010_v35  ;;  %v2426_v40 = vadd.f32 %v2425_v38, %v2424_v33 }
 0x1ac   :  { %v2406_v41 = vpop.f32.mrf.mxu0  ;;  %v2427_v42 = vpop.f32.mrf.mxu1 }
 0x1ad   :  { %v2090_v43 = vadd.f32 %v2426_v40, %v2050_v39 }
 0x1ae   :  { %v2428_v44 = vpop.f32.mrf.mxu1 }
 0x1af   :  { %2095 = vst [vmem:[#allocation9] sm:$0x3] %v2090_v43 }
 0x1b0   :  { %2655 = shalt.err (!%p2652_p5)
}
 0x1b1   :  { %2115 = dma.vmem_to_hbm [thread:$0]  %s2113_s29, 32, %s2802_s3, [#allocation10]  }
 0x1b2   :  { %2668 = dma.done.wait [#allocation5], 512  }
 0x1b3   :  { %2669 = vsyncadd [#allocation5], 4294966784 }
 0x1b4   :  { %2670 = dma.done.wait [#allocation10], 32  }
 0x1b5   :  { %2671 = vsyncadd [#allocation10], 4294967264 }
 0x1b6   :  { %2122 = vsyncpa [#allocation4], 1 }
 0x1b7   :  { %2123 = vsyncpa [#allocation7], 1 }
 0x1b8   :  { %2124 = vsyncpa [#allocation5], 1 }
 0x1b9   :  { %2125 = vsyncpa [#allocation10], 1 }

</bundles_post_ra>
